<compile_context>
chip_gen: v7x
topology: tpu7x:2x2x1
jax: 0.10.0
libtpu: 0.0.40
codegen_flags: <defaults>
</compile_context>

<pallas_src>
import functools

import jax
import jax.numpy as jnp
from jax.experimental import pallas as pl
from jax.experimental.pallas import tpu as pltpu

LANE = 128                     # lane width (minor vreg dim)
SUB = 8                        # f32 sublane tile (second-minor vreg dim)
BLOCK_ROWS_REDUCE = 8192       # 4 MiB per f32 input buffer per grid step
BLOCK_ROWS_NONE = 4096         # 'none' path also streams a full-size output
NUM_CHUNKS = 2                 # leading 'parallel' axis (2 TensorCores on v7x)
PAD_LOGIT = -1e4               # pad (logit, target) = (-1e4, 0) -> loss == 0
VMEM_LIMIT = 32 * 1024 * 1024  # fits v5e/v6e/v7x scoped-VMEM constraints


def _round_up(a, b):
    return pl.cdiv(a, b) * b


def _row_align(*dtypes):
    """Sublane alignment so every input's packed (k*8,128) tile is respected."""
    a = SUB
    for dt in dtypes:
        bits = jnp.dtype(dt).itemsize * 8
        a = max(a, SUB * 32 // bits)   # 8 for 32-bit, 16 for 16-bit, 32 for 8-bit
    return a


def _focal_terms(x, t, alpha, gamma, hard_labels):
    """Elementwise focal-loss math in f32 (VPU + EUP). x, t are f32."""
    e = jnp.exp(-jnp.abs(x))                       # exp(-|x|), reused twice
    # Numerically stable BCE-with-logits: max(x,0) - x*t + log1p(exp(-|x|))
    bce = jnp.maximum(x, 0.0) - x * t + jnp.log1p(e)
    # sigmoid(x) from e:  x>=0 -> 1/(1+e) ;  x<0 -> e/(1+e)
    inv = pl.reciprocal(1.0 + e, approx=False)     # EUP slot, exact
    p = jnp.where(x >= 0.0, inv, e * inv)
    if hard_labels:
        # t is exactly 0 or 1: skip the soft blend (saves ~4 VALU ops/elem)
        omp = jnp.where(t >= 0.5, 1.0 - p, p)
    else:
        pt = p * t + (1.0 - p) * (1.0 - t)
        omp = 1.0 - pt
    g = float(gamma)
    if g.is_integer() and 0.0 <= g <= 8.0:
        gi = int(g)
        if gi == 0:
            fp = jnp.ones_like(omp)
        else:
            fp = omp
            for _ in range(gi - 1):
                fp = fp * omp
    else:
        fp = jnp.power(omp, g)
    if float(alpha) != 1.0:
        fp = float(alpha) * fp
    return fp * bce


def _focal_reduce_kernel(x_ref, t_ref, out_ref, *, alpha, gamma, hard_labels):
    """grid = (chunks, steps); axis 1 is the reduction axis.  The output block
    is a tiny resident (SUB, LANE) VMEM accumulator per chunk."""
    i = pl.program_id(1)

    @pl.when(i == 0)
    def _init():
        out_ref[...] = jnp.zeros_like(out_ref)

    x = x_ref[...].astype(jnp.float32)
    t = t_ref[...].astype(jnp.float32)
    loss = _focal_terms(x, t, alpha, gamma, hard_labels)
    # Split-major-dim reshape is layout-free; axis-0 sum is pure vreg adds.
    block_rows = loss.shape[0]
    out_ref[...] += loss.reshape(block_rows // SUB, SUB, LANE).sum(axis=0)


def _focal_none_kernel(x_ref, t_ref, o_ref, *, alpha, gamma, hard_labels):
    x = x_ref[...].astype(jnp.float32)
    t = t_ref[...].astype(jnp.float32)
    o_ref[...] = _focal_terms(x, t, alpha, gamma, hard_labels).astype(o_ref.dtype)


def _as_slab(a, rows_padded, pad_value):
    """Flatten to [rows_padded, LANE] in the array's own dtype.

    Pads only when the size does not tile.  Pad values are chosen so padded
    elements yield exactly zero loss, so no in-kernel mask is needed.
    """
    flat = jnp.ravel(a)
    n = flat.shape[0]
    n_pad = rows_padded * LANE
    if n_pad != n:
        # Note: for huge non-divisible inputs this full-array pad copy could be
        # avoided by processing the bulk pad-free and the ragged tail in XLA.
        flat = jnp.pad(flat, (0, n_pad - n), constant_values=pad_value)
    return flat.reshape(rows_padded, LANE)


def focal_loss(logits, targets, alpha=1.0, gamma=2.0, reduction="mean"):
    """Pallas implementation of FocalLoss.forward (binary, with logits)."""
    assert logits.shape == targets.shape
    orig_shape = logits.shape
    n = logits.size

    # Hard {0,1} labels (bool / int) get the cheaper omp path and a narrow
    # bf16 HBM stream; float targets are streamed in their own dtype.
    hard_labels = not jnp.issubdtype(targets.dtype, jnp.floating)
    if hard_labels:
        targets = targets.astype(jnp.bfloat16)

    rows = pl.cdiv(n, LANE)
    align = _row_align(logits.dtype, targets.dtype)

    if reduction in ("mean", "sum"):
        block_rows = min(BLOCK_ROWS_REDUCE, _round_up(rows, align))
        num_blocks = pl.cdiv(rows, block_rows)
        chunks = min(NUM_CHUNKS, num_blocks)
        num_blocks = _round_up(num_blocks, chunks)
        steps = num_blocks // chunks
        rows_padded = num_blocks * block_rows

        x2 = _as_slab(logits, rows_padded, PAD_LOGIT)
        t2 = _as_slab(targets, rows_padded, 0.0)

        in_spec = pl.BlockSpec((block_rows, LANE),
                               lambda c, i: (c * steps + i, 0))
        # One resident (SUB, LANE) accumulator block per chunk.
        out_spec = pl.BlockSpec((SUB, LANE), lambda c, i: (c, 0))

        kernel = functools.partial(
            _focal_reduce_kernel, alpha=float(alpha), gamma=float(gamma),
            hard_labels=bool(hard_labels))

        partial_acc = pl.pallas_call(
            kernel,
            out_shape=jax.ShapeDtypeStruct((chunks * SUB, LANE), jnp.float32),
            grid=(chunks, steps),
            in_specs=[in_spec, in_spec],
            out_specs=out_spec,
            compiler_params=pltpu.CompilerParams(
                dimension_semantics=("parallel", "arbitrary"),
                vmem_limit_bytes=VMEM_LIMIT),
        )(x2, t2)

        total = jnp.sum(partial_acc)     # tiny (chunks*8, 128) XLA reduce
        if reduction == "mean":
            total = total / jnp.float32(n)
        # Match the input dtype like PyTorch (accumulation itself was f32).
        return total.astype(logits.dtype)

    elif reduction == "none":
        block_rows = min(BLOCK_ROWS_NONE, _round_up(rows, align))
        num_blocks = pl.cdiv(rows, block_rows)
        rows_padded = num_blocks * block_rows

        x2 = _as_slab(logits, rows_padded, PAD_LOGIT)
        t2 = _as_slab(targets, rows_padded, 0.0)

        spec = pl.BlockSpec((block_rows, LANE), lambda i: (i, 0))
        kernel = functools.partial(
            _focal_none_kernel, alpha=float(alpha), gamma=float(gamma),
            hard_labels=bool(hard_labels))

        out2 = pl.pallas_call(
            kernel,
            out_shape=jax.ShapeDtypeStruct((rows_padded, LANE), logits.dtype),
            grid=(num_blocks,),
            in_specs=[spec, spec],
            out_specs=spec,
            compiler_params=pltpu.CompilerParams(
                dimension_semantics=("parallel",),
                vmem_limit_bytes=VMEM_LIMIT),
        )(x2, t2)

        if rows_padded * LANE != n:
            return out2.reshape(-1)[:n].reshape(orig_shape)
        return out2.reshape(orig_shape)

    else:
        raise ValueError(f"unknown reduction: {reduction}")


def _focal_loss_ref(logits, targets, alpha=1.0, gamma=2.0, reduction="mean"):
    """Pure-JAX reference (matches the PyTorch module's math)."""
    x = logits.astype(jnp.float32)
    t = targets.astype(jnp.float32)
    bce = jnp.maximum(x, 0.0) - x * t + jnp.log1p(jnp.exp(-jnp.abs(x)))
    p = jax.nn.sigmoid(x)
    pt = p * t + (1.0 - p) * (1.0 - t)
    loss = alpha * jnp.power(1.0 - pt, gamma) * bce
    if reduction == "mean":
        return loss.mean()
    if reduction == "sum":
        return loss.sum()
    return loss


if __name__ == "__main__":
    key = jax.random.PRNGKey(0)
    alpha, gamma = 1.0, 2.0
    k1, k2, k3, k4, k5, k6 = jax.random.split(key, 6)

    # Case 1: NCHW shape whose flattened size tiles evenly (no padding path).
    shape = (2, 4, 16, 16)
    logits = jax.random.normal(k1, shape, dtype=jnp.float32)
    targets = jax.random.bernoulli(k2, p=0.3, shape=shape).astype(jnp.float32)

    out_mean = jax.block_until_ready(
        focal_loss(logits, targets, alpha, gamma, reduction="mean"))
    out_sum = jax.block_until_ready(
        focal_loss(logits, targets, alpha, gamma, reduction="sum"))
    out_none = jax.block_until_ready(
        focal_loss(logits, targets, alpha, gamma, reduction="none"))

    ref_mean = _focal_loss_ref(logits, targets, alpha, gamma, "mean")
    ref_sum = _focal_loss_ref(logits, targets, alpha, gamma, "sum")
    ref_none = _focal_loss_ref(logits, targets, alpha, gamma, "none")

    assert jnp.allclose(out_mean, ref_mean, rtol=1e-5, atol=1e-5), (out_mean, ref_mean)
    assert jnp.allclose(out_sum, ref_sum, rtol=1e-5, atol=1e-4), (out_sum, ref_sum)
    assert jnp.allclose(out_none, ref_none, rtol=1e-5, atol=1e-5)
    assert out_none.shape == shape

    # Case 2: odd shape to exercise the zero-loss pad-value path.
    shape2 = (3, 5, 7, 11)
    logits2 = jax.random.normal(k3, shape2, dtype=jnp.float32)
    targets2 = jax.random.bernoulli(k4, p=0.5, shape=shape2).astype(jnp.float32)

    out_mean2 = jax.block_until_ready(
        focal_loss(logits2, targets2, alpha, gamma, reduction="mean"))
    out_none2 = jax.block_until_ready(
        focal_loss(logits2, targets2, alpha, gamma, reduction="none"))

    ref_mean2 = _focal_loss_ref(logits2, targets2, alpha, gamma, "mean")
    ref_none2 = _focal_loss_ref(logits2, targets2, alpha, gamma, "none")

    assert jnp.allclose(out_mean2, ref_mean2, rtol=1e-5, atol=1e-5), (out_mean2, ref_mean2)
    assert jnp.allclose(out_none2, ref_none2, rtol=1e-5, atol=1e-5)
    assert out_none2.shape == shape2

    # Case 3: bool (hard) labels -> bf16 target stream + hard-label fast path.
    shape3 = (2, 4, 16, 16)
    logits3 = jax.random.normal(k5, shape3, dtype=jnp.float32)
    targets3 = jax.random.bernoulli(k6, p=0.25, shape=shape3)  # bool

    out_mean3 = jax.block_until_ready(
        focal_loss(logits3, targets3, alpha, gamma, reduction="mean"))
    out_none3 = jax.block_until_ready(
        focal_loss(logits3, targets3, alpha, gamma, reduction="none"))

    ref_mean3 = _focal_loss_ref(logits3, targets3, alpha, gamma, "mean")
    ref_none3 = _focal_loss_ref(logits3, targets3, alpha, gamma, "none")

    assert jnp.allclose(out_mean3, ref_mean3, rtol=1e-5, atol=1e-5), (out_mean3, ref_mean3)
    assert jnp.allclose(out_none3, ref_none3, rtol=1e-5, atol=1e-5)

    print("KERNEL_OK")
</pallas_src>

<mosaic_0001>
module attributes {stable_mosaic.version = 11 : i64} {
  func.func @_focal_reduce_kernel(%arg0: i32, %arg1: i32, %arg2: memref<16x128xf32, #tpu.memory_space<vmem>>, %arg3: memref<16x128xf32, #tpu.memory_space<vmem>>, %arg4: memref<8x128xf32, #tpu.memory_space<vmem>>) attributes {dimension_semantics = [#tpu.dimension_semantics<parallel>, #tpu.dimension_semantics<arbitrary>], iteration_bounds = array<i64: 1, 1>, scalar_prefetch = 0 : i64, scratch_operands = 0 : i64, tpu.core_type = #tpu.core_type<tc>, window_params = [{transform_indices = @transform_0, window_bounds = array<i64: 16, 128>}, {transform_indices = @transform_1, window_bounds = array<i64: 16, 128>}, {transform_indices = @transform_2, window_bounds = array<i64: 8, 128>}]} {
    %c0_i32 = arith.constant 0 : i32
    %0 = arith.cmpi eq, %arg1, %c0_i32 : i32
    %1 = arith.extui %0 : i1 to i32
    %c0_i32_0 = arith.constant 0 : i32
    %2 = arith.cmpi ne, %1, %c0_i32_0 : i32
    scf.if %2 {
      %cst_15 = arith.constant 0.000000e+00 : f32
      %38 = vector.broadcast %cst_15 : f32 to vector<8x128xf32>
      %c0_16 = arith.constant 0 : index
      %c0_17 = arith.constant 0 : index
      %39 = vector.load %arg4[%c0_16, %c0_17] : memref<8x128xf32, #tpu.memory_space<vmem>>, vector<8x128xf32>
      tpu.vector_store %arg4[%c0_16, %c0_17], %38 {strides = array<i32>} : memref<8x128xf32, #tpu.memory_space<vmem>>, vector<8x128xf32>,
    } else {
    }
    %c0 = arith.constant 0 : index
    %c0_1 = arith.constant 0 : index
    %3 = vector.load %arg2[%c0, %c0_1] : memref<16x128xf32, #tpu.memory_space<vmem>>, vector<16x128xf32>
    %c0_2 = arith.constant 0 : index
    %c0_3 = arith.constant 0 : index
    %4 = vector.load %arg3[%c0_2, %c0_3] : memref<16x128xf32, #tpu.memory_space<vmem>>, vector<16x128xf32>
    %5 = math.absf %3 : vector<16x128xf32>
    %cst = arith.constant 0.000000e+00 : f32
    %6 = vector.broadcast %cst : f32 to vector<16x128xf32>
    %7 = arith.subf %6, %5 : vector<16x128xf32>
    %8 = math.exp %7 : vector<16x128xf32>
    %cst_4 = arith.constant 0.000000e+00 : f32
    %9 = vector.broadcast %cst_4 : f32 to vector<16x128xf32>
    %10 = arith.maximumf %3, %9 : vector<16x128xf32>
    %11 = arith.mulf %3, %4 : vector<16x128xf32>
    %12 = arith.subf %10, %11 : vector<16x128xf32>
    %13 = math.log1p %8 : vector<16x128xf32>
    %14 = arith.addf %12, %13 : vector<16x128xf32>
    %cst_5 = arith.constant 1.000000e+00 : f32
    %15 = vector.broadcast %cst_5 : f32 to vector<16x128xf32>
    %16 = arith.addf %15, %8 : vector<16x128xf32>
    %17 = tpu.reciprocal %16 : vector<16x128xf32> -> vector<16x128xf32>
    %cst_6 = arith.constant 0.000000e+00 : f32
    %18 = vector.broadcast %cst_6 : f32 to vector<16x128xf32>
    %19 = arith.cmpf oge, %3, %18 : vector<16x128xf32>
    %20 = arith.mulf %8, %17 : vector<16x128xf32>
    %21 = arith.select %19, %17, %20 : vector<16x128xi1>, vector<16x128xf32>
    %22 = arith.mulf %21, %4 : vector<16x128xf32>
    %cst_7 = arith.constant 1.000000e+00 : f32
    %23 = vector.broadcast %cst_7 : f32 to vector<16x128xf32>
    %24 = arith.subf %23, %21 : vector<16x128xf32>
    %cst_8 = arith.constant 1.000000e+00 : f32
    %25 = vector.broadcast %cst_8 : f32 to vector<16x128xf32>
    %26 = arith.subf %25, %4 : vector<16x128xf32>
    %27 = arith.mulf %24, %26 : vector<16x128xf32>
    %28 = arith.addf %22, %27 : vector<16x128xf32>
    %cst_9 = arith.constant 1.000000e+00 : f32
    %29 = vector.broadcast %cst_9 : f32 to vector<16x128xf32>
    %30 = arith.subf %29, %28 : vector<16x128xf32>
    %31 = arith.mulf %30, %30 : vector<16x128xf32>
    %32 = arith.mulf %31, %14 : vector<16x128xf32>
    %c0_10 = arith.constant 0 : index
    %c0_11 = arith.constant 0 : index
    %33 = vector.load %arg4[%c0_10, %c0_11] : memref<8x128xf32, #tpu.memory_space<vmem>>, vector<8x128xf32>
    %34 = vector.shape_cast %32 : vector<16x128xf32> to vector<2x8x128xf32>
    %cst_12 = arith.constant dense<0.000000e+00> : vector<8x128xf32>
    %35 = vector.multi_reduction <add>, %34, %cst_12 [0] : vector<2x8x128xf32> to vector<8x128xf32>
    %36 = arith.addf %33, %35 : vector<8x128xf32>
    %c0_13 = arith.constant 0 : index
    %c0_14 = arith.constant 0 : index
    %37 = vector.load %arg4[%c0_13, %c0_14] : memref<8x128xf32, #tpu.memory_space<vmem>>, vector<8x128xf32>
    tpu.vector_store %arg4[%c0_13, %c0_14], %36 {strides = array<i32>} : memref<8x128xf32, #tpu.memory_space<vmem>>, vector<8x128xf32>,
    return
  }
  func.func @transform_0(%arg0: i32, %arg1: i32) -> (i32, i32) {
    %c1_i32 = arith.constant 1 : i32
    %0 = arith.muli %arg0, %c1_i32 : i32
    %1 = arith.addi %0, %arg1 : i32
    %c0_i32 = arith.constant 0 : i32
    %c0_i32_0 = arith.constant 0 : i32
    return %1, %c0_i32 : i32, i32
  }
  func.func @transform_1(%arg0: i32, %arg1: i32) -> (i32, i32) {
    %c1_i32 = arith.constant 1 : i32
    %0 = arith.muli %arg0, %c1_i32 : i32
    %1 = arith.addi %0, %arg1 : i32
    %c0_i32 = arith.constant 0 : i32
    %c0_i32_0 = arith.constant 0 : i32
    return %1, %c0_i32 : i32, i32
  }
  func.func @transform_2(%arg0: i32, %arg1: i32) -> (i32, i32) {
    %c0_i32 = arith.constant 0 : i32
    %c0_i32_0 = arith.constant 0 : i32
    return %arg0, %c0_i32 : i32, i32
  }
}

</mosaic_0001>

<bundles_post_ra>
// kernel: tpu_custom_call.1
= control target key start
LH: loop header
LB: loop body
LE: loop exit
PB: predicated region body
PF: predicated region fallthrough
CT: control target
= control target key end

     0   :  { %7 = vsyncpa [#allocation3], 0  ;;  %s293_s0 = inlined_call_operand.hbm [shape: f32[16,128], index: 0, kind: input, shape index: {}]   ;;  %s294_s1 = inlined_call_operand.hbm [shape: f32[16,128], index: 1, kind: input, shape index: {}]   ;;  %s295_s2 = inlined_call_operand.hbm [shape: f32[8,128], index: 2, kind: output, shape index: {}]  }
   0x1   :  { %8 = vsyncpa [#allocation6], 0 }
   0x2   :  { %9 = vsyncpa [#allocation4], 0  ;;  %s231_s9 = smov [#allocation2]   ;;  %s159_s13 = scalar_lea.hbm %s293_s0, 256 }
   0x3   :  { %s19_s10 = sshll.u32 %s231_s9, 4  ;;  %p160_p0 = scmp.ne.s32.totalorder %s293_s0, %s159_s13  ;;  %s20_s10 = int_to_ptr.vmem [resolvable:$true] %s19_s10 }
   0x4   :  { %p163_p1 = scmp.lt.u32.totalorder %s159_s13, %s293_s0 }
   0x6   :  { %p165_p2 = pnand %p163_p1, %p160_p0 }
   0x8   :  { %168 = shalt.err (!%p165_p2)
}
   0x9   :  { %s169_s18 = scalar_lea.vmem %s20_s10, 256  ;;  %p174_p4 = scmp.lt.s32.totalorder %s20_s10, %s20_s10 }
   0xa   :  { %p170_p3 = scmp.ne.s32.totalorder %s20_s10, %s169_s18  ;;  %p175_p5 = scmp.lt.s32.totalorder %s169_s18, %s169_s18 }
   0xc   :  { %p176_p6 = por %p175_p5, %p174_p4 }
   0xe   :  { %p177_p7 = pnand %p176_p6, %p170_p3 }
  0x10   :  { %180 = shalt.err (!%p177_p7)
}
  0x11   :  { %s232_s19 = smov 128   ;;  %s233_s20 = smov 8  }
  0x12   :  { %25 = dma.hbm_to_vmem [thread:$0]  %s293_s0, 256, %s20_s10, [#allocation3], %s232_s19, %s232_s19, %s233_s20  }
  0x13   :  { %s234_s23 = smov [#allocation5]   ;;  %s181_s27 = scalar_lea.hbm %s294_s1, 256 }
  0x14   :  { %s35_s24 = sshll.u32 %s234_s23, 4  ;;  %p182_p8 = scmp.ne.s32.totalorder %s294_s1, %s181_s27  ;;  %s36_s24 = int_to_ptr.vmem [resolvable:$true] %s35_s24 }
  0x15   :  { %p185_p9 = scmp.lt.u32.totalorder %s181_s27, %s294_s1 }
  0x17   :  { %p187_p10 = pnand %p185_p9, %p182_p8 }
  0x19   :  { %190 = shalt.err (!%p187_p10)
}
  0x1a   :  { %s191_s4 = scalar_lea.vmem %s36_s24, 256  ;;  %p196_p12 = scmp.lt.s32.totalorder %s36_s24, %s36_s24 }
  0x1b   :  { %p192_p11 = scmp.ne.s32.totalorder %s36_s24, %s191_s4  ;;  %p197_p13 = scmp.lt.s32.totalorder %s191_s4, %s191_s4 }
  0x1d   :  { %p198_p0 = por %p197_p13, %p196_p12 }
  0x1f   :  { %p199_p1 = pnand %p198_p0, %p192_p11 }
  0x21   :  { %202 = shalt.err (!%p199_p1)
}
  0x22   :  { %41 = dma.hbm_to_vmem [thread:$0]  %s294_s1, 256, %s36_s24, [#allocation6], %s232_s19, %s232_s19, %s233_s20  }
  0x23   :  { %225 = dma.done.wait [#allocation3], 256  }
  0x24   :  { %226 = vsyncadd [#allocation3], 4294967040 }
  0x25   :  { %227 = dma.done.wait [#allocation6], 256  }
  0x26   :  { %228 = vsyncadd [#allocation6], 4294967040  ;;  %v57_v0 = vld [vmem:[#allocation2] sm:$0xff]  ;;  %v58_v1 = vld [vmem:[#allocation2 + $0x8] sm:$0xff]  ;;  %s235_s1 = smov [#allocation7]  }
  0x27   :  { %v61_v2 = vand.u32 2147483647, %v57_v0  ;;  %v62_v3 = vand.u32 2147483647, %v58_v1  ;;  %v59_v17 = vld [vmem:[#allocation5] sm:$0xff]  ;;  %v60_v18 = vld [vmem:[#allocation5 + $0x8] sm:$0xff] }
  0x28   :  { %v69_v22 = vmax.f32 %v57_v0, 0.0  ;;  %v70_v23 = vmax.f32 %v58_v1, 0.0  ;;  %v71_v24 = vmul.f32 %v59_v17, %v57_v0  ;;  %vm99_vm0 = vcmp.ge.f32.partialorder %v57_v0, 0.0  ;;  %s131_s6 = sshll.u32 %s235_s1, 4  ;;  %s132_s6 = int_to_ptr.vmem [resolvable:$true] %s131_s6 }
  0x29   :  { %v63_v4 = vsub.f32 0.0, %v61_v2  ;;  %v64_v5 = vsub.f32 0.0, %v62_v3  ;;  %v72_v26 = vmul.f32 %v60_v18, %v58_v1  ;;  %vm100_vm1 = vcmp.ge.f32.partialorder %v58_v1, 0.0  ;;  %s203_s7 = scalar_lea.vmem %s132_s6, 128  ;;  %p208_p3 = scmp.lt.s32.totalorder %s132_s6, %s132_s6 }
  0x2a   :  { %v109_v31 = vsub.f32 1.0, %v59_v17  ;;  %v110_v32 = vsub.f32 1.0, %v60_v18  ;;  %v73_v43 = vsub.f32 %v69_v22, %v71_v24  ;;  %p204_p2 = scmp.ne.s32.totalorder %s132_s6, %s203_s7  ;;  %p209_p4 = scmp.lt.s32.totalorder %s203_s7, %s203_s7 }
  0x2b   :  { %v65_v6 = vmul.f32 1.442695, %v63_v4  ;;  %v67_v7 = vmul.f32 1.442695, %v64_v5  ;;  %v74_v45 = vsub.f32 %v70_v23, %v72_v26 }
  0x2c   :  { %p210_p5 = por %p209_p4, %p208_p3 }
  0x2d   :  { %147 = vpow2.f32 %v65_v6 }
  0x2e   :  { %149 = vpow2.f32 %v67_v7  ;;  %p211_p6 = pnand %p210_p5, %p204_p2 }
  0x37   :  { %v148_v8 = vpop.eup %147 }
  0x38   :  { %v150_v9 = vpop.eup %149  ;;  %v75_v10 = vadd.f32 1.0, %v148_v8  ;;  %v78_v12 = vmul.f32 -0.5, %v148_v8  ;;  %v81_v15 = vand.u32 2147483647, %v148_v8 }
  0x39   :  { %v84_v11 = vadd.f32 1.0, %v150_v9  ;;  %v87_v13 = vmul.f32 -0.5, %v150_v9  ;;  %v90_v27 = vand.u32 2147483647, %v150_v9 }
  0x3a   :  { %151 = vlog2.f32 %v75_v10  ;;  %v79_v19 = vadd.f32 1.0, %v78_v12  ;;  %vm275_vm2 = vcmp.lt.f32.partialorder %v81_v15, 0.0004427343 }
  0x3b   :  { %153 = vlog2.f32 %v84_v11  ;;  %v88_v20 = vadd.f32 1.0, %v87_v13  ;;  %vm91_vm3 = vcmp.lt.f32.partialorder %v90_v27, 0.0004427343 }
  0x3c   :  { %155 = vrcp.f32 %v75_v10  ;;  %v80_v34 = vmul.f32 %v148_v8, %v79_v19 }
  0x3d   :  { %157 = vrcp.f32 %v84_v11  ;;  %v89_v35 = vmul.f32 %v150_v9, %v88_v20 }
  0x44   :  { %v152_v14 = vpop.eup %151 }
  0x45   :  { %v154_v16 = vpop.eup %153  ;;  %v77_v33 = vmul.f32 0.6931472, %v152_v14 }
  0x46   :  { %v156_v21 = vpop.eup %155  ;;  %v86_v37 = vmul.f32 0.6931472, %v154_v16 }
  0x47   :  { %v158_v25 = vpop.eup %157  ;;  %v101_v28 = vmul.f32 %v156_v21, %v148_v8  ;;  %v83_v46 = vsel %vm275_vm2, %v80_v34, %v77_v33 }
  0x48   :  { %v102_v30 = vmul.f32 %v158_v25, %v150_v9  ;;  %v92_v48 = vsel %vm91_vm3, %v89_v35, %v86_v37  ;;  %v93_v51 = vadd.f32 %v83_v46, %v73_v43 }
  0x49   :  { %v103_v36 = vsel %vm99_vm0, %v156_v21, %v101_v28  ;;  %v94_v53 = vadd.f32 %v92_v48, %v74_v45 }
  0x4a   :  { %v104_v38 = vsel %vm100_vm1, %v158_v25, %v102_v30  ;;  %v105_v39 = vmul.f32 %v103_v36, %v59_v17  ;;  %v107_v40 = vsub.f32 1.0, %v103_v36 }
  0x4b   :  { %v106_v41 = vmul.f32 %v104_v38, %v60_v18  ;;  %v108_v42 = vsub.f32 1.0, %v104_v38 }
  0x4c   :  { %v111_v44 = vmul.f32 %v109_v31, %v107_v40 }
  0x4d   :  { %v112_v47 = vmul.f32 %v110_v32, %v108_v42 }
  0x4e   :  { %v113_v49 = vadd.f32 %v111_v44, %v105_v39 }
  0x4f   :  { %v114_v50 = vadd.f32 %v112_v47, %v106_v41 }
  0x50   :  { %v115_v52 = vsub.f32 1.0, %v113_v49 }
  0x51   :  { %v116_v54 = vsub.f32 1.0, %v114_v50 }
  0x52   :  { %v117_v55 = vmul.f32 %v115_v52, %v115_v52 }
  0x53   :  { %v118_v56 = vmul.f32 %v116_v54, %v116_v54 }
  0x54   :  { %v119_v57 = vmul.f32 %v117_v55, %v93_v51 }
  0x55   :  { %v120_v58 = vmul.f32 %v118_v56, %v94_v53 }
  0x57   :  { %v122_v59 = vadd.f32 %v120_v58, %v119_v57 }
  0x59   :  { %124 = vst [vmem:[#allocation7] sm:$0xff] %v122_v59 }
  0x5a   :  { %214 = shalt.err (!%p211_p6)
}
  0x5b   :  { %s215_s10 = scalar_lea.hbm %s295_s2, 128 }
  0x5c   :  { %p216_p7 = scmp.ne.s32.totalorder %s295_s2, %s215_s10  ;;  %p219_p8 = scmp.lt.u32.totalorder %s215_s10, %s295_s2 }
  0x5e   :  { %p221_p9 = pnand %p219_p8, %p216_p7 }
  0x60   :  { %224 = shalt.err (!%p221_p9)
}
  0x61   :  { %134 = dma.vmem_to_hbm [thread:$0]  %s132_s6, 128, %s295_s2, [#allocation4]  }
  0x62   :  { %229 = dma.done.wait [#allocation4], 128  }
  0x63   :  { %230 = vsyncadd [#allocation4], 4294967168 }
  0x64   :  { %138 = vsyncpa [#allocation3], 1 }
  0x65   :  { %139 = vsyncpa [#allocation6], 1 }
  0x66   :  { %140 = vsyncpa [#allocation4], 1 }

</bundles_post_ra>
